<compile_context>
chip_gen: v7x
topology: tpu7x:2x2x1
jax: 0.10.0
libtpu: 0.0.40
codegen_flags: <defaults>
</compile_context>

<pallas_src>
import functools

import jax
import jax.numpy as jnp
from jax.experimental import pallas as pl
from jax.experimental.pallas import tpu as pltpu


def _aligner_kernel(*refs, add_identity: bool, add_bias: bool):
    if add_bias:
        m_ref, x_ref, b_ref, out_ref, reg_ref, m_eff = refs
    else:
        m_ref, x_ref, out_ref, reg_ref, m_eff = refs
        b_ref = None

    j = pl.program_id(1)  # N-tile index (inner, "arbitrary" axis)

    # Once per batch element (first N tile): build the effective matrix,
    # stash it in a VMEM scratch that stays resident across the N tiles,
    # and compute the orthogonality regularizer.
    @pl.when(j == 0)
    def _():
        m = m_ref[0].astype(jnp.float32)                       # (D, D)
        d = m.shape[0]
        row = jax.lax.broadcasted_iota(jnp.int32, (d, d), 0)
        col = jax.lax.broadcasted_iota(jnp.int32, (d, d), 1)
        eye = (row == col).astype(jnp.float32)                 # built once, reused
        if add_identity:
            m = m + eye
        m_eff[...] = m

        # Gram matrix M @ M^T without an explicit transpose: contract the
        # last dim of both operands directly on the MXU.
        g = jax.lax.dot_general(
            m, m,
            dimension_numbers=(((1,), (1,)), ((), ())),
            preferred_element_type=jnp.float32)
        diff = g - eye
        reg = jnp.sqrt(jnp.sum(diff * diff))
        # Lane-dense write (avoids 1-lane masked vst); wrapper slices [0, 0].
        reg_ref[...] = jnp.full(reg_ref.shape, reg, dtype=reg_ref.dtype)

    # Per-tile matmul: (D, D) @ (D, TN) on the MXU, f32 accumulation.
    y = jnp.dot(m_eff[...], x_ref[0], preferred_element_type=jnp.float32)
    if add_bias:
        y = y + b_ref[0]                                       # (D, 1) bcast over TN
    out_ref[0] = y.astype(out_ref.dtype)


def _pick_tile_n(D, N, itemsize=4, buffer_budget_bytes=24 * 1024 * 1024):
    """Largest lane-aligned N tile that divides N and keeps the double-buffered
    x/out tiles within the VMEM budget (safe for v5e/v6e/v7x)."""
    if N % 128 != 0:
        return N  # block must then cover the full (non lane-aligned) dim
    # Per-step pipelined buffers: x tile + out tile, each double-buffered.
    cap = buffer_budget_bytes // (4 * D * itemsize)
    cap = max(128, min(N, (cap // 128) * 128, 4096))
    tn = cap
    while N % tn != 0:
        tn -= 128
    return tn


def base_aligner_forward(x, parameters, *, add_identity=True, add_bias=True,
                         tile_n=None):
    """x: (B, D, N) float32, parameters: (B, D*D [+ D]) float32."""
    B, D, N = x.shape
    m_raw = parameters[:, : D * D].reshape(B, D, D)

    tn = tile_n if tile_n is not None else _pick_tile_n(D, N, x.dtype.itemsize)
    assert N % tn == 0, "tile_n must divide N"
    n_tiles = N // tn

    inputs = [m_raw, x]
    in_specs = [
        # M stays block-resident across the N axis.
        pl.BlockSpec((1, D, D), lambda b, j: (b, 0, 0)),
        # x is streamed tile-by-tile along N.
        pl.BlockSpec((1, D, tn), lambda b, j: (b, 0, j)),
    ]
    if add_bias:
        bias = parameters[:, D * D: D * D + D].reshape(B, D, 1)
        inputs.append(bias)
        in_specs.append(pl.BlockSpec((1, D, 1), lambda b, j: (b, 0, 0)))

    kernel = functools.partial(
        _aligner_kernel, add_identity=add_identity, add_bias=add_bias)

    # Rough per-step VMEM need: double-buffered x/out tiles + M (double-buffered)
    # + resident m_eff scratch + bias + lane-padded reg block.
    need_bytes = (4 * D * tn + 3 * D * D + 2 * D + 2 * 8 * 128) * 4
    vmem_limit = int(min(max(2 * need_bytes, 16 * 1024 * 1024), 48 * 1024 * 1024))

    out, reg_padded = pl.pallas_call(
        kernel,
        out_shape=(
            jax.ShapeDtypeStruct((B, D, N), x.dtype),
            jax.ShapeDtypeStruct((B, 8, 128), jnp.float32),
        ),
        grid_spec=pltpu.PrefetchScalarGridSpec(
            num_scalar_prefetch=0,
            grid=(B, n_tiles),
            in_specs=in_specs,
            out_specs=[
                pl.BlockSpec((1, D, tn), lambda b, j: (b, 0, j)),
                # reg block is independent of the N axis (written at j == 0).
                pl.BlockSpec((1, 8, 128), lambda b, j: (b, 0, 0)),
            ],
            scratch_shapes=[pltpu.VMEM((D, D), jnp.float32)],
        ),
        compiler_params=pltpu.CompilerParams(
            # reg output / m_eff scratch are resident across the N axis, so it
            # must be "arbitrary"; batch axis is independent -> megacore parallel.
            dimension_semantics=("parallel", "arbitrary"),
            vmem_limit_bytes=vmem_limit,
        ),
    )(*inputs)

    return out, reg_padded[:, 0, 0]


def _reference(x, parameters, *, add_identity=True, add_bias=True):
    B, D, N = x.shape
    m = parameters[:, : D * D].reshape(B, D, D)
    if add_identity:
        m = m + jnp.eye(D, dtype=m.dtype)
    out = jnp.einsum("bij,bjn->bin", m, x)
    if add_bias:
        out = out + parameters[:, D * D: D * D + D][:, :, None]
    g = jnp.einsum("bij,bkj->bik", m, m) - jnp.eye(D, dtype=m.dtype)
    reg = jnp.sqrt(jnp.sum(g * g, axis=(1, 2)))
    return out, reg


def _check(x, params, **kw):
    out, reg = base_aligner_forward(x, params, **{k: v for k, v in kw.items()})
    jax.block_until_ready((out, reg))
    ref_out, ref_reg = _reference(
        x, params,
        add_identity=kw.get("add_identity", True),
        add_bias=kw.get("add_bias", True))
    assert out.shape == x.shape and reg.shape == (x.shape[0],)
    assert jnp.allclose(out, ref_out, atol=1e-4, rtol=1e-4)
    assert jnp.allclose(reg, ref_reg, atol=1e-4, rtol=1e-4)


if __name__ == "__main__":
    key = jax.random.PRNGKey(0)

    # Test 1: driver shape (B=2, D=8, N=16) -> single N tile per batch element.
    B, D, N = 2, 8, 16
    kx, kp, key = jax.random.split(key, 3)
    x1 = jax.random.normal(kx, (B, D, N), dtype=jnp.float32)
    p1 = 0.1 * jax.random.normal(kp, (B, D * D + D), dtype=jnp.float32)
    _check(x1, p1, add_identity=True, add_bias=True)

    # Test 2: lane-aligned N exercising the multi-tile pipelined path.
    B2, D2, N2 = 2, 16, 256
    kx2, kp2, key = jax.random.split(key, 3)
    x2 = jax.random.normal(kx2, (B2, D2, N2), dtype=jnp.float32)
    p2 = 0.1 * jax.random.normal(kp2, (B2, D2 * D2 + D2), dtype=jnp.float32)
    _check(x2, p2, add_identity=True, add_bias=True, tile_n=128)

    # Test 3: no-bias path (no dummy bias array allocated / DMA'd).
    _check(x2, p2, add_identity=False, add_bias=False, tile_n=128)

    print("KERNEL_OK")
</pallas_src>

<mosaic_0001>
module attributes {stable_mosaic.version = 11 : i64} {
  func.func @_aligner_kernel(%arg0: i32, %arg1: i32, %arg2: memref<1x8x8xf32, #tpu.memory_space<vmem>>, %arg3: memref<1x8x16xf32, #tpu.memory_space<vmem>>, %arg4: memref<1x8x1xf32, #tpu.memory_space<vmem>>, %arg5: memref<1x8x16xf32, #tpu.memory_space<vmem>>, %arg6: memref<1x8x128xf32, #tpu.memory_space<vmem>>, %arg7: memref<8x8xf32, #tpu.memory_space<vmem>>) attributes {dimension_semantics = [#tpu.dimension_semantics<parallel>, #tpu.dimension_semantics<arbitrary>], iteration_bounds = array<i64: 2, 1>, scalar_prefetch = 0 : i64, scratch_operands = 1 : i64, tpu.core_type = #tpu.core_type<tc>, window_params = [{transform_indices = @transform_0, window_bounds = array<i64: 1, 8, 8>}, {transform_indices = @transform_1, window_bounds = array<i64: 1, 8, 16>}, {transform_indices = @transform_2, window_bounds = array<i64: 1, 8, 1>}, {transform_indices = @transform_3, window_bounds = array<i64: 1, 8, 16>}, {transform_indices = @transform_4, window_bounds = array<i64: 1, 8, 128>}]} {
    %c0_i32 = arith.constant 0 : i32
    %0 = arith.cmpi eq, %arg1, %c0_i32 : i32
    %1 = arith.extui %0 : i1 to i32
    %c0_i32_0 = arith.constant 0 : i32
    %2 = arith.cmpi ne, %1, %c0_i32_0 : i32
    scf.if %2 {
      %c0_11 = arith.constant 0 : index
      %c0_12 = arith.constant 0 : index
      %c0_13 = arith.constant 0 : index
      %14 = vector.load %arg2[%c0_11, %c0_12, %c0_13] : memref<1x8x8xf32, #tpu.memory_space<vmem>>, vector<1x8x8xf32>
      %15 = vector.shape_cast %14 : vector<1x8x8xf32> to vector<8x8xf32>
      %16 = tpu.iota {dimensions = array<i32: 0>} : vector<8x8xi32>
      %17 = tpu.iota {dimensions = array<i32: 1>} : vector<8x8xi32>
      %18 = arith.cmpi eq, %16, %17 : vector<8x8xi32>
      %19 = arith.extui %18 : vector<8x8xi1> to vector<8x8xi32>
      %20 = arith.sitofp %19 : vector<8x8xi32> to vector<8x8xf32>
      %21 = arith.addf %15, %20 : vector<8x8xf32>
      %c0_14 = arith.constant 0 : index
      %c0_15 = arith.constant 0 : index
      %22 = vector.load %arg7[%c0_14, %c0_15] : memref<8x8xf32, #tpu.memory_space<vmem>>, vector<8x8xf32>
      tpu.vector_store %arg7[%c0_14, %c0_15], %21 {strides = array<i32>} : memref<8x8xf32, #tpu.memory_space<vmem>>, vector<8x8xf32>,
      %cst_16 = arith.constant dense<0.000000e+00> : vector<8x8xf32>
      %23 = tpu.matmul %21, %21, %cst_16 {dimension_numbers = #tpu.dot_dimension_numbers<[1], [1], [0], [0], [0, 0, 1, 0], [], []>} : vector<8x8xf32>, vector<8x8xf32>, vector<8x8xf32> -> vector<8x8xf32>
      %24 = arith.subf %23, %20 : vector<8x8xf32>
      %25 = arith.mulf %24, %24 : vector<8x8xf32>
      %26 = vector.shape_cast %25 : vector<8x8xf32> to vector<1x8x8xf32>
      %cst_17 = arith.constant dense<0.000000e+00> : vector<1xf32>
      %27 = vector.multi_reduction <add>, %26, %cst_17 [1, 2] : vector<1x8x8xf32> to vector<1xf32>
      %28 = vector.shape_cast %27 : vector<1xf32> to vector<1x1x1xf32>
      %29 = vector.extract %28[0, 0, 0] : f32 from vector<1x1x1xf32>
      %30 = math.sqrt %29 : f32
      %31 = vector.broadcast %30 : f32 to vector<1x8x128xf32>
      %c0_18 = arith.constant 0 : index
      %c0_19 = arith.constant 0 : index
      %c0_20 = arith.constant 0 : index
      %32 = vector.load %arg6[%c0_18, %c0_19, %c0_20] : memref<1x8x128xf32, #tpu.memory_space<vmem>>, vector<1x8x128xf32>
      tpu.vector_store %arg6[%c0_18, %c0_19, %c0_20], %31 {strides = array<i32>} : memref<1x8x128xf32, #tpu.memory_space<vmem>>, vector<1x8x128xf32>,
    } else {
    }
    %c0 = arith.constant 0 : index
    %c0_1 = arith.constant 0 : index
    %3 = vector.load %arg7[%c0, %c0_1] : memref<8x8xf32, #tpu.memory_space<vmem>>, vector<8x8xf32>
    %c0_2 = arith.constant 0 : index
    %c0_3 = arith.constant 0 : index
    %c0_4 = arith.constant 0 : index
    %4 = vector.load %arg3[%c0_2, %c0_3, %c0_4] : memref<1x8x16xf32, #tpu.memory_space<vmem>>, vector<1x8x16xf32>
    %5 = vector.shape_cast %4 : vector<1x8x16xf32> to vector<8x16xf32>
    %cst = arith.constant dense<0.000000e+00> : vector<8x16xf32>
    %6 = tpu.matmul %3, %5, %cst {dimension_numbers = #tpu.dot_dimension_numbers<[1], [0], [0], [1], [0, 0, 1, 1], [], []>} : vector<8x8xf32>, vector<8x16xf32>, vector<8x16xf32> -> vector<8x16xf32>
    %c0_5 = arith.constant 0 : index
    %c0_6 = arith.constant 0 : index
    %c0_7 = arith.constant 0 : index
    %7 = vector.load %arg4[%c0_5, %c0_6, %c0_7] : memref<1x8x1xf32, #tpu.memory_space<vmem>>, vector<1x8x1xf32>
    %8 = vector.shape_cast %7 : vector<1x8x1xf32> to vector<8x1xf32>
    %9 = vector.broadcast %8 : vector<8x1xf32> to vector<8x16xf32>
    %10 = arith.addf %6, %9 : vector<8x16xf32>
    %c0_8 = arith.constant 0 : index
    %c0_9 = arith.constant 0 : index
    %c0_10 = arith.constant 0 : index
    %11 = vector.load %arg5[%c0_8, %c0_9, %c0_10] : memref<1x8x16xf32, #tpu.memory_space<vmem>>, vector<1x8x16xf32>
    %12 = vector.shape_cast %11 : vector<1x8x16xf32> to vector<8x16xf32>
    %13 = vector.shape_cast %10 : vector<8x16xf32> to vector<1x8x16xf32>
    tpu.vector_store %arg5[%c0_8, %c0_9, %c0_10], %13 {strides = array<i32>} : memref<1x8x16xf32, #tpu.memory_space<vmem>>, vector<1x8x16xf32>,
    return
  }
  func.func @transform_0(%arg0: i32, %arg1: i32) -> (i32, i32, i32) {
    %c0_i32 = arith.constant 0 : i32
    %c0_i32_0 = arith.constant 0 : i32
    %c0_i32_1 = arith.constant 0 : i32
    return %arg0, %c0_i32, %c0_i32_0 : i32, i32, i32
  }
  func.func @transform_1(%arg0: i32, %arg1: i32) -> (i32, i32, i32) {
    %c0_i32 = arith.constant 0 : i32
    %c0_i32_0 = arith.constant 0 : i32
    return %arg0, %c0_i32, %arg1 : i32, i32, i32
  }
  func.func @transform_2(%arg0: i32, %arg1: i32) -> (i32, i32, i32) {
    %c0_i32 = arith.constant 0 : i32
    %c0_i32_0 = arith.constant 0 : i32
    %c0_i32_1 = arith.constant 0 : i32
    return %arg0, %c0_i32, %c0_i32_0 : i32, i32, i32
  }
  func.func @transform_3(%arg0: i32, %arg1: i32) -> (i32, i32, i32) {
    %c0_i32 = arith.constant 0 : i32
    %c0_i32_0 = arith.constant 0 : i32
    return %arg0, %c0_i32, %arg1 : i32, i32, i32
  }
  func.func @transform_4(%arg0: i32, %arg1: i32) -> (i32, i32, i32) {
    %c0_i32 = arith.constant 0 : i32
    %c0_i32_0 = arith.constant 0 : i32
    %c0_i32_1 = arith.constant 0 : i32
    return %arg0, %c0_i32, %c0_i32_0 : i32, i32, i32
  }
}

</mosaic_0001>

<bundles_post_ra>
// kernel: tpu_custom_call.1
= control target key start
LH: loop header
LB: loop body
LE: loop exit
PB: predicated region body
PF: predicated region fallthrough
CT: control target
= control target key end

     0   :  { %10 = vsyncpa [#allocation4], 0  ;;  %s1147_s0 = inlined_call_operand.vmem [shape: f32[2,8,8], index: 0, kind: input, shape index: {}]   ;;  %s1148_s1 = inlined_call_operand.hbm [shape: f32[2,8,16], index: 1, kind: input, shape index: {}]   ;;  %s1149_s2 = inlined_call_operand.vmem [shape: f32[2,8,1], index: 2, kind: input, shape index: {}]   ;;  %s1150_s3 = inlined_call_operand.hbm [shape: f32[2,8,16], index: 3, kind: output, shape index: {0}]   ;;  %s1151_s4 = inlined_call_operand.hbm [shape: f32[2,8,128], index: 4, kind: output, shape index: {1}]  }
   0x1   :  { %12 = vsyncpa [#allocation4 + $0x1], 0 }
   0x2   :  { %13 = vsyncpa [#allocation5], 0 }
   0x3   :  { %15 = vsyncpa [#allocation5 + $0x1], 0 }
   0x4   :  { %16 = vsyncpa [#allocation8], 0 }
   0x5   :  { %18 = vsyncpa [#allocation8 + $0x1], 0  ;;  %s929_s15 = smov 0   ;;  %s931_s16 = smov 0  }
   0x6   :  { %s933_s17 = smov 0   ;;  %s935_s18 = smov 0  }
   0x7   :  { %s937_s19 = smov 0   ;;  %s939_s20 = smov 0  }
   0x8 LB: > { %s639_s21 = sadd.s32 4294967295, %s896_s20   ;;  %s640_s22 = sadd.s32 4294967294, %s896_s20   ;;  %s896_s20 = sphi %s939_s20, %s24_s20   ;;  %s892_s19 = sphi %s937_s19, %s1167_s19   ;;  %s888_s18 = sphi %s935_s18, %s1166_s18   ;;  %s884_s17 = sphi %s933_s17, %s1165_s17   ;;  %s880_s16 = sphi %s931_s16, %s1164_s16   ;;  %s876_s15 = sphi %s929_s15, %s1163_s15  }
   0x9   : > { %s36_s23 = sadd.s32 1, %s892_s19  ;;  %s71_s24 = sadd.s32 1, %s884_s17 }
   0xa   : > { %p38_p0 = scmp.ge.s32.totalorder %s36_s23, 2  ;;  %p78_p1 = scmp.ne.s32.totalorder %s884_s17, %s880_s16 }
   0xb   : > { %p79_p2 = scmp.eq.s32.totalorder %s896_s20, 0  ;;  %p84_p3 = scmp.ne.s32.totalorder %s880_s16, %s876_s15 }
   0xc   : > { %s1169_s23 = smov (%p38_p0, %s36_s23), 0  ;;  %p85_p5 = scmp.eq.s32.totalorder %s639_s21, 0 }
   0xd   : > { %p970_p4 = por %p79_p2, %p78_p1  ;;  %s66_s26 = ssub.s32 %s892_s19, %s1169_s23 }
   0xe   : > { %p136_p6 = scmp.eq.s32.totalorder %s639_s21, 1  ;;  %p69_p7 = scmp.eq.s32.totalorder %s66_s26, 0 }
   0xf   : > { %p976_p8 = por %p85_p5, %p84_p3  ;;  %p142_p10 = scmp.eq.s32.totalorder %s640_s22, 1 }
  0x10   : > { %p980_p9 = por %p136_p6, %p78_p1  ;;  %p696_p13 = scmp.lt.s32.totalorder %s896_s20, 2 }
  0x11   : > { %s985_s29 = scalar_select %p69_p7, %s884_s17, %s71_s24  }
  0x12   : > { %s1155_s28 = scalar_select %p980_p9, 1, 0 }
  0x13   : > { %p987_p11 = por %p142_p10, %p84_p3  ;;  %s195_s5 = sand.u32 1, %s884_s17  }
  0x14   : > { %s643_s6 = sshll.u32 %s195_s5, 3  ;;  %s644_s7 = sshll.u32 %s892_s19, 7 }
  0x15   : > { %s1156_s30 = scalar_select %p987_p11, 1, 0 }
  0x16   : > { %s998_s10 = scalar_lea.hbm %s1148_s1, %s644_s7  ;;  %s199_s11 = scalar_lea.vmem [#allocation3], %s643_s6 }
  0x17   : > { %s207_s12 = sshll.u32 %s199_s11, 4  ;;  %p1004_p0 = pnand %p696_p13, %p970_p4  ;;  %s1000_s12 = int_to_ptr.vmem [resolvable:$true] %s207_s12 }
  0x18   : > { %s196_s14 = scalar_lea.sflag [#allocation4], %s195_s5  ;;  %s752_s21 = scalar_lea.hbm %s998_s10, 128 }
  0x19   : > { %p753_p3 = scmp.ne.s32.totalorder %s998_s10, %s752_s21  ;;  %p754_p5 = pneg %p1004_p0 }
  0x1a   : > { %s757_s25 = scalar_lea.hbm %s1148_s1, 256  ;;  %p758_p4 = scmp.lt.u32.totalorder %s998_s10, %s1148_s1 }
  0x1b   : > { %p755_p6 = pnand %p754_p5, %p753_p3  ;;  %p759_p10 = scmp.lt.u32.totalorder %s757_s25, %s752_s21 }
  0x1c   : > { %p761_p12 = scmp.lt.u32.totalorder %s752_s21, %s998_s10 }
  0x1d   : > { %p756_p7 = pneg %p755_p6  ;;  %p760_p13 = por %p759_p10, %p758_p4 }
  0x1f   : > { %p762_p1 = por %p761_p12, %p760_p13 }
  0x21   : > { %p763_p2 = pnand %p762_p1, %p756_p7 }
  0x23   : > { %766 = shalt.err (!%p763_p2)
}
  0x24   : > { %s767_s5 = scalar_lea.vmem %s1000_s12, 128  ;;  %s898_s7 = smov [#allocation3]  }
  0x25   : > { %p768_p3 = scmp.ne.s32.totalorder %s1000_s12, %s767_s5  ;;  %s772_s8 = sshll.u32 %s898_s7, 4  ;;  %s773_s8 = int_to_ptr.vmem [resolvable:$false] %s772_s8 }
  0x26   : > { %s774_s9 = scalar_lea.vmem %s773_s8, 256  ;;  %p775_p9 = scmp.lt.s32.totalorder %s1000_s12, %s773_s8 }
  0x27   : > { %p770_p6 = pnand %p768_p3, %p754_p5  ;;  %p776_p4 = scmp.lt.s32.totalorder %s774_s9, %s767_s5 }
  0x29   : > { %p771_p11 = pneg %p770_p6  ;;  %p777_p10 = por %p776_p4, %p775_p9 }
  0x2b   : > { %p778_p12 = pnand %p777_p10, %p771_p11 }
  0x2d   : > { %781 = shalt.err (!%p778_p12)
}
  0x2e   : > { %688 = dma.hbm_to_vmem [thread:$0]  (!%p1004_p0), %s998_s10, 128, %s1000_s12, %s196_s14  }
  0x2f   : > { %p1158_p1 = scmp.lt.s32.totalorder %s896_s20, 3  ;;  %p1159_p2 = scmp.ge.s32.totalorder %s896_s20, 1 }
  0x31   : > { %p220_p5 = pnand %p1159_p2, %p1158_p1 }
  0x32   : > { %s1040_s11 = sand.u32 (!%p220_p5), 1, %s880_s16  }
  0x33   : > { %223 = sbr.rel (%p220_p5) target bundleno = 584 (0x248), region = 32  ;;  %s1043_s21 = sshll.u32 (!%p220_p5), %s1040_s11, 3 }
  0x34   : > { %s226_s22 = scalar_lea.sflag (!%p220_p5), [#allocation4], %s1040_s11  ;;  %s229_s13 = scalar_lea.vmem (!%p220_p5), [#allocation3], %s1043_s21 }
  0x3a   : > { %863 = dma.done.wait (%p976_p8), %s226_s22, 128  }
  0x3b   : > { %865 = vsyncadd (%p976_p8), %s226_s22, 4294967168  ;;  %p267_p9 = scmp.lt.s32.totalorder %s888_s18, 1  ;;  %v280_v0 = vlaneseq  ;;  %v899_v1 = vmov 0.0   ;;  %vm900_vm0 = vmmov 0   ;;  %vm288_vm2 = vcmask 64512   ;;  %v387_v7 = vld [vmem:[%s229_s13] sm:$0xff] }
  0x3c   : > { %665 = vmatprep.subr.mxu0 %v899_v1  ;;  %667 = vmatprep.mubr.msk.f32.mxu0 %vm900_vm0, %v899_v1  ;;  %v901_v9 = vmov 0   ;;  %s657_s5 = sshll.u32 %s888_s18, 7  ;;  %s259_s7 = scalar_lea.vmem [#allocation6], %s1043_s21  ;;  %vm468_vm3 = vcmask 130048  }
  0x3d   : > { %s268_s10 = scalar_select %p267_p9, %s888_s18, 1  ;;  %v281_v2 = vshrl.u32 %v280_v0, 7  ;;  %v283_v3 = vand.u32 127, %v280_v0  ;;  %670 = vmatprep.subr.mxu1 %v899_v1  ;;  %672 = vmatprep.mubr.msk.f32.mxu1 %vm900_vm0, %v899_v1 }
  0x3e   : > { %671 = vmatpush3.msra.mxu1 %v387_v7  ;;  %749 = vset.pattern.permute.xlu0 %v901_v9  ;;  %s490_s8 = sshll.u32 %s259_s7, 4  ;;  %s1066_s13 = scalar_lea.hbm %s1150_s3, %s657_s5  ;;  %s1068_s8 = int_to_ptr.vmem [resolvable:$true] %s490_s8 }
  0x3f   : > { %s649_s12 = sshll.u32 %s268_s10, 3  ;;  %vm284_vm1 = vcmp.eq.s32.totalorder %v281_v2, %v283_v3  ;;  %s471_s10 = scalar_lea.sflag [#allocation5], %s1040_s11 }
  0x40   : > { %s270_s27 = scalar_lea.vmem %s1147_s0, %s649_s12  ;;  %v651_v4 = vsel %vm284_vm1, 1.0, %v899_v1  ;;  %s274_s6 = scalar_lea.vmem %s1149_s2, %s649_s12 }
  0x41   : > { %v279_v5 = vld [vmem:[%s270_s27] sm:$0xff]  ;;  %s782_s12 = scalar_lea.vmem %s1068_s8, 128  ;;  %p1160_p11 = scmp.ne.s32.totalorder %s1155_s28, 0 }
  0x42   : > { %v287_v6 = vadd.f32 %v651_v4, %v279_v5  ;;  %v388_v15 = vld [vmem:[%s274_s6] sm:$0xff]  ;;  %p783_p8 = scmp.ne.s32.totalorder %s1068_s8, %s782_s12  ;;  %s902_s14 = smov [#allocation6]  }
  0x43   : > { %s786_s24 = sshll.u32 %s902_s14, 4  ;;  %s787_s24 = int_to_ptr.vmem [resolvable:$false] %s786_s24 }
  0x44   : > { %289 = vst.msk [vmem:[#allocation2] sm:$0xff] %vm288_vm2, %v287_v6  ;;  %666 = vmatpush3.xpose.msk.msra.mxu0 %vm288_vm2, %v287_v6  ;;  %p784_p0 = pnand %p783_p8, %p1160_p11  ;;  %s788_s27 = scalar_lea.vmem %s787_s24, 256 }
  0x45   : > { %p789_p13 = scmp.lt.s32.totalorder %s1068_s8, %s787_s24  ;;  %p790_p3 = scmp.lt.s32.totalorder %s788_s27, %s782_s12 }
  0x46   : > { %p785_p7 = pneg %p784_p0 }
  0x47   : > { %668 = vmatmul.mubr.msk.f32.vlgmr.msra.gmra.mrb[0].mxu0 %vm288_vm2, %v287_v6  ;;  %p791_p6 = por %p790_p3, %p789_p13 }
  0x49   : > { %p792_p4 = pnand %p791_p6, %p785_p7 }
  0x4b   : > { %v386_v8 = vld [vmem:[#allocation2] sm:$0xff] }
  0x4c   : > { %673 = vmatmul.mubr.msk.f32.vlgmr.msra.gmra.mrb[0].mxu1 %vm288_vm2, %v386_v8 }
 0x11a   : > { %v359_v10 = vpop.f32.mrb[0].mxu0 }
 0x11b   : > { %v363_v11 = vsub.f32 %v359_v10, %v651_v4  ;;  %v669_v12 = vpop.f32.mrb[1].mxu0 }
 0x11d   : > { %v364_v13 = vmul.f32 %v363_v11, %v363_v11 }
 0x11f   : > { %v365_v14 = vsel %vm288_vm2, %v364_v13, 0.0  ;;  %v464_v16 = vpop.f32.mrb[0].mxu1 }
 0x120   : > { %366 = vadd.xlane.f32.xlu0 %v365_v14  ;;  %v674_v17 = vpop.f32.mrb[1].mxu1 }
 0x136   : > { %391 = vperm.xlu0 %749, %v388_v15  }
 0x1ad   : > { %v367_v18 = vpop.xlane.xlu0 %366 }
 0x1ae   : > { %v368_v19 = vrot.slane %v367_v18, 4 }
 0x1b0   : > { %v369_v20 = vadd.f32 %v368_v19, %v367_v18 }
 0x1b2   : > { %v370_v21 = vrot.slane %v369_v20, 2 }
 0x1b4   : > { %v371_v22 = vadd.f32 %v370_v21, %v369_v20 }
 0x1b5   : > { %v392_v23 = vpop.permute.xlu0 %391 }
 0x1b6   : > { %v372_v24 = vrot.slane %v371_v22, 1  ;;  %v465_v25 = vadd.f32 %v464_v16, %v392_v23 }
 0x1b8   : > { %v373_v26 = vadd.f32 %v372_v24, %v371_v22  ;;  %469 = vst.msk [vmem:[%s259_s7] sm:$0xff] %vm468_vm3, %v465_v25 }
 0x1b9   : > { %795 = shalt.err (!%p792_p4)
}
 0x1ba   : > { %s796_s25 = scalar_lea.hbm %s1066_s13, 128  ;;  %s800_s7 = scalar_lea.hbm %s1150_s3, 256 }
 0x1bb   : > { %p797_p10 = scmp.ne.s32.totalorder %s1066_s13, %s796_s25  ;;  %p801_p2 = scmp.lt.u32.totalorder %s1066_s13, %s1150_s3 }
 0x1bc   : > { %p802_p5 = scmp.lt.u32.totalorder %s800_s7, %s796_s25  ;;  %p804_p8 = scmp.lt.u32.totalorder %s796_s25, %s1066_s13 }
 0x1bd   : > { %p798_p12 = pnand %p797_p10, %p1160_p11 }
 0x1be   : > { %p803_p9 = por %p802_p5, %p801_p2 }
 0x1bf   : > { %p799_p1 = pneg %p798_p12 }
 0x1c0   : > { %p805_p0 = por %p804_p8, %p803_p9 }
 0x1c2   : > { %p806_p7 = pnand %p805_p0, %p799_p1 }
 0x1c4   : > { %809 = shalt.err (!%p806_p7)
}
 0x1c5   : > { %681 = dma.vmem_to_hbm [thread:$0]  (%p1160_p11), %s1068_s8, 128, %s1066_s13, %s471_s10   ;;  %675 = vpush %v373_v26 }
 0x1c6   : > { %s266_s14 = scalar_lea.vmem [#allocation7], %s1043_s21  ;;  %s1100_s27 = scalar_lea.hbm %s1151_s4, %s657_s5 }
 0x1c7   : > { %s503_s24 = sshll.u32 %s266_s14, 4  ;;  %s476_s25 = scalar_lea.sflag [#allocation8], %s1040_s11  ;;  %s1093_s24 = int_to_ptr.vmem [resolvable:$true] %s503_s24 }
 0x1c8   : > { %s810_s26 = scalar_lea.vmem %s1093_s24, 128  ;;  %s903_s21 = smov [#allocation7]  }
 0x1c9   : > { %p811_p13 = scmp.ne.s32.totalorder %s1093_s24, %s810_s26  ;;  %s814_s6 = sshll.u32 %s903_s21, 4  ;;  %s815_s6 = int_to_ptr.vmem [resolvable:$false] %s814_s6 }
 0x1ca   : > { %s816_s7 = scalar_lea.vmem %s815_s6, 256  ;;  %p817_p4 = scmp.lt.s32.totalorder %s1093_s24, %s815_s6 }
 0x1cb   : > { %p812_p3 = pnand %p811_p13, %p1160_p11  ;;  %p818_p10 = scmp.lt.s32.totalorder %s816_s7, %s810_s26 }
 0x1cd   : > { %p813_p6 = pneg %p812_p3  ;;  %p819_p12 = por %p818_p10, %p817_p4 }
 0x1cf   : > { %p820_p1 = pnand %p819_p12, %p813_p6 }
 0x1f6   : > { %s676_s12 = spop %675 }
 0x1f7   : > { %v375_v27 = vstv %s676_s12 }
 0x1f8   : > { %750 = vrsqrt.f32 %v375_v27  ;;  %vm378_vm4 = vcmp.eq.f32.partialorder %v375_v27, inf  ;;  %v381_v30 = vand.u32 2147483648, %v375_v27  ;;  %vm380_vm5 = vcmp.eq.f32.partialorder %v375_v27, 0.0 }
 0x202   : > { %v751_v28 = vpop.eup %750 }
 0x203   : > { %v377_v29 = vmul.f32 %v751_v28, %v375_v27 }
 0x205   : > { %v379_v31 = vsel %vm378_vm4, %v375_v27, %v377_v29 }
 0x206   : > { %v382_v32 = vsel %vm380_vm5, %v381_v30, %v379_v31 }
 0x207   : > { %677 = vpush %v382_v32 }
 0x238   : > { %s678_s8 = spop %677 }
 0x239   : > { %v384_v33 = vstv %s678_s8 }
 0x23a   : > { %385 = vst [vmem:[%s266_s14] sm:$0xff] %v384_v33 }
 0x23b   : > { %823 = shalt.err (!%p820_p1)
}
 0x23c   : > { %s824_s18 = scalar_lea.hbm %s1100_s27, 128  ;;  %s828_s9 = scalar_lea.hbm %s1151_s4, 256 }
 0x23d   : > { %p825_p2 = scmp.ne.s32.totalorder %s1100_s27, %s824_s18  ;;  %p829_p8 = scmp.lt.u32.totalorder %s1100_s27, %s1151_s4 }
 0x23e   : > { %p830_p0 = scmp.lt.u32.totalorder %s828_s9, %s824_s18  ;;  %p832_p13 = scmp.lt.u32.totalorder %s824_s18, %s1100_s27 }
 0x23f   : > { %p826_p5 = pnand %p825_p2, %p1160_p11 }
 0x240   : > { %p831_p7 = por %p830_p0, %p829_p8 }
 0x241   : > { %p827_p9 = pneg %p826_p5 }
 0x242   : > { %p833_p3 = por %p832_p13, %p831_p7 }
 0x244   : > { %p834_p6 = pnand %p833_p3, %p827_p9 }
 0x246   : > { %837 = shalt.err (!%p834_p6)
}
 0x247   : > { %682 = dma.vmem_to_hbm [thread:$0]  (%p1160_p11), %s1093_s24, 128, %s1100_s27, %s476_s25  }
 0x248 PF: > { %s515_s14 = sand.u32 1, %s876_s15   ;;  %p1161_p4 = scmp.ne.s32.totalorder %s1156_s30, 0 }
 0x249   : > { %p1162_p10 = scmp.ge.s32.totalorder %s896_s20, 2  ;;  %s516_s8 = scalar_lea.sflag [#allocation5], %s515_s14 }
 0x24b   : > { %p690_p12 = pnand %p1162_p10, %p1161_p4 }
 0x24d   : > { %867 = dma.done.wait (!%p690_p12), %s516_s8, 128  }
 0x24e   : > { %869 = vsyncadd (!%p690_p12), %s516_s8, 4294967168  ;;  %s525_s13 = scalar_lea.sflag [#allocation8], %s515_s14 }
 0x24f   : > { %871 = dma.done.wait (!%p690_p12), %s525_s13, 128  }
 0x250   : > { %873 = vsyncadd (!%p690_p12), %s525_s13, 4294967168  ;;  %s24_s20 = sadd.s32 1, %s896_s20   ;;  %s1163_s15 = smov %s880_s16 }
 0x251   : > { %p21_p1 = scmp.ge.s32.totalorder %s24_s20, 4   ;;  %s1164_s16 = smov %s884_s17 }
 0x252   : > { %s1165_s17 = smov %s985_s29  ;;  %s1166_s18 = smov %s892_s19 }
 0x253   : > { %s1167_s19 = smov %s1169_s23  ;;  %23 = sbr.rel (!%p21_p1) target bundleno = 8 (0x8), region = 104 }
 0x25a   :  { %530 = vsyncpa [#allocation4], 1 }
 0x25b   :  { %532 = vsyncpa [#allocation4 + $0x1], 1 }
 0x25c   :  { %533 = vsyncpa [#allocation5], 1 }
 0x25d   :  { %535 = vsyncpa [#allocation5 + $0x1], 1 }
 0x25e   :  { %536 = vsyncpa [#allocation8], 1 }
 0x25f   :  { %538 = vsyncpa [#allocation8 + $0x1], 1 }

</bundles_post_ra>
